<compile_context>
chip_gen: v6e
topology: v6e:2x2x1
jax: 0.10.0
libtpu: 0.0.40
codegen_flags: <defaults>
</compile_context>

<pallas_src>
import functools

import jax
import jax.numpy as jnp
from jax.experimental import pallas as pl
from jax.experimental.pallas import tpu as pltpu


def _lstm_recurrence_kernel(gx_ref, whh_ref, z_ref, *, hidden):
    """Single-invocation LSTM recurrence.

    gx_ref : (T, B, 4H)  precomputed x_t @ W_ih^T + (b_ih + b_hh), time-major
    whh_ref: (H, 4H)     W_hh^T (recurrent weights)
    z_ref  : (B, T, H)   hidden-state sequence, batch-first (PyTorch layout)
    """
    H = hidden
    T, B, _ = gx_ref.shape

    whh = whh_ref[...]                       # load once; resident in vregs
    h = jnp.zeros((B, H), jnp.float32)       # state lives in vregs, not VMEM
    c = jnp.zeros((B, H), jnp.float32)

    # T is small and static: fully unrolled loop (static slices, full LLO
    # visibility).  TODO(synk): for long sequences use lax.fori_loop + pl.ds.
    for t in range(T):
        gates = gx_ref[t] + jnp.dot(h, whh, preferred_element_type=jnp.float32)
        i_g = jax.nn.sigmoid(gates[:, 0 * H:1 * H])
        f_g = jax.nn.sigmoid(gates[:, 1 * H:2 * H])
        g_g = jnp.tanh(gates[:, 2 * H:3 * H])
        o_g = jax.nn.sigmoid(gates[:, 3 * H:4 * H])
        c = f_g * c + i_g * g_g
        h = o_g * jnp.tanh(c)
        # VMEM store only; the single HBM writeback DMA happens at kernel end.
        z_ref[:, t, :] = h.astype(z_ref.dtype)


@jax.jit
def encoder_forward(w, w_ih, w_hh, b_ih, b_hh):
    """w: (B, T, D) float32 (batch_first). Returns z: (B, T, H)."""
    B, T, D = w.shape
    H = w_hh.shape[1]
    f32 = jnp.float32

    # Hoisted input projection: one matmul for ALL timesteps (classic LSTM
    # restructure).  Emitted time-major so the kernel indexes gx[t] directly.
    gx = jnp.einsum(
        "btd,gd->tbg", w.astype(f32), w_ih.astype(f32),
        preferred_element_type=f32,
    ) + (b_ih + b_hh).astype(f32)                      # (T, B, 4H)
    whh_t = jnp.transpose(w_hh).astype(f32)            # (H, 4H)

    z = pl.pallas_call(
        functools.partial(_lstm_recurrence_kernel, hidden=H),
        out_shape=jax.ShapeDtypeStruct((B, T, H), f32),
        grid_spec=pltpu.PrefetchScalarGridSpec(
            num_scalar_prefetch=0,
            grid=(1,),                                  # single kernel invocation
            in_specs=[
                pl.BlockSpec((T, B, 4 * H), lambda i: (0, 0, 0)),  # gx (resident)
                pl.BlockSpec((H, 4 * H), lambda i: (0, 0)),        # W_hh^T (resident)
            ],
            out_specs=pl.BlockSpec((B, T, H), lambda i: (0, 0, 0)),
        ),
        compiler_params=pltpu.CompilerParams(
            dimension_semantics=("arbitrary",),
        ),
    )(gx, whh_t)
    return z


def _reference_lstm(w, w_ih, w_hh, b_ih, b_hh):
    """Pure-JAX reference matching torch.nn.LSTM forward (batch_first)."""
    B, T, D = w.shape
    H = w_hh.shape[1]
    h = jnp.zeros((B, H), jnp.float32)
    c = jnp.zeros((B, H), jnp.float32)

    def step(carry, x_t):
        h, c = carry
        gates = x_t @ w_ih.T + h @ w_hh.T + b_ih + b_hh
        i = jax.nn.sigmoid(gates[:, 0 * H:1 * H])
        f = jax.nn.sigmoid(gates[:, 1 * H:2 * H])
        g = jnp.tanh(gates[:, 2 * H:3 * H])
        o = jax.nn.sigmoid(gates[:, 3 * H:4 * H])
        c = f * c + i * g
        h = o * jnp.tanh(c)
        return (h, c), h

    (_, _), hs = jax.lax.scan(step, (h, c), jnp.transpose(w, (1, 0, 2)))
    return jnp.transpose(hs, (1, 0, 2))


if __name__ == "__main__":
    # Small shapes consistent with the module: batch=2, seq=8, in_size=4, latent=32
    B, T, D, H = 2, 8, 4, 32

    key = jax.random.PRNGKey(0)
    k_w, k_wih, k_whh, k_bih, k_bhh = jax.random.split(key, 5)

    # PyTorch-style U(-1/sqrt(H), 1/sqrt(H)) parameter init (deterministic)
    bound = 1.0 / jnp.sqrt(jnp.float32(H))
    w_ih = jax.random.uniform(k_wih, (4 * H, D), jnp.float32, -bound, bound)
    w_hh = jax.random.uniform(k_whh, (4 * H, H), jnp.float32, -bound, bound)
    b_ih = jax.random.uniform(k_bih, (4 * H,), jnp.float32, -bound, bound)
    b_hh = jax.random.uniform(k_bhh, (4 * H,), jnp.float32, -bound, bound)

    w = jax.random.normal(k_w, (B, T, D), jnp.float32)

    z = jax.block_until_ready(encoder_forward(w, w_ih, w_hh, b_ih, b_hh))

    z_ref = _reference_lstm(w, w_ih, w_hh, b_ih, b_hh)
    assert z.shape == (B, T, H)
    assert jnp.allclose(z, z_ref, atol=1e-5, rtol=1e-5)

    print("KERNEL_OK")
</pallas_src>

<mosaic_0001>
module attributes {stable_mosaic.version = 11 : i64} {
  func.func @_lstm_recurrence_kernel(%arg0: i32, %arg1: memref<8x2x128xf32, #tpu.memory_space<vmem>>, %arg2: memref<32x128xf32, #tpu.memory_space<vmem>>, %arg3: memref<2x8x32xf32, #tpu.memory_space<vmem>>) attributes {dimension_semantics = [#tpu.dimension_semantics<arbitrary>], iteration_bounds = array<i64: 1>, scalar_prefetch = 0 : i64, scratch_operands = 0 : i64, tpu.core_type = #tpu.core_type<tc>, window_params = [{pipeline_mode = #tpu.pipeline_mode<synchronous>, transform_indices = @transform_0, window_bounds = array<i64: 8, 2, 128>}, {pipeline_mode = #tpu.pipeline_mode<synchronous>, transform_indices = @transform_1, window_bounds = array<i64: 32, 128>}, {pipeline_mode = #tpu.pipeline_mode<synchronous>, transform_indices = @transform_2, window_bounds = array<i64: 2, 8, 32>}]} {
    %c0 = arith.constant 0 : index
    %c0_0 = arith.constant 0 : index
    %0 = vector.load %arg2[%c0, %c0_0] : memref<32x128xf32, #tpu.memory_space<vmem>>, vector<32x128xf32>
    %cst = arith.constant 0.000000e+00 : f32
    %1 = vector.broadcast %cst : f32 to vector<2x32xf32>
    %cst_1 = arith.constant 0.000000e+00 : f32
    %2 = vector.broadcast %cst_1 : f32 to vector<2x32xf32>
    %c0_2 = arith.constant 0 : index
    %c0_3 = arith.constant 0 : index
    %c0_4 = arith.constant 0 : index
    %3 = vector.load %arg1[%c0_2, %c0_3, %c0_4] : memref<8x2x128xf32, #tpu.memory_space<vmem>>, vector<1x2x128xf32>
    %4 = vector.shape_cast %3 : vector<1x2x128xf32> to vector<2x128xf32>
    %cst_5 = arith.constant dense<0.000000e+00> : vector<2x128xf32>
    %5 = tpu.matmul %1, %0, %cst_5 {dimension_numbers = #tpu.dot_dimension_numbers<[1], [0], [0], [1], [0, 0, 1, 1], [], []>} : vector<2x32xf32>, vector<32x128xf32>, vector<2x128xf32> -> vector<2x128xf32>
    %6 = arith.addf %4, %5 : vector<2x128xf32>
    %7 = vector.extract_strided_slice %6 {offsets = [0, 0], sizes = [2, 32], strides = [1, 1]} : vector<2x128xf32> to vector<2x32xf32>
    %8 = arith.negf %7 : vector<2x32xf32>
    %9 = math.exp %8 : vector<2x32xf32>
    %cst_6 = arith.constant 1.000000e+00 : f32
    %10 = vector.broadcast %cst_6 : f32 to vector<2x32xf32>
    %11 = arith.addf %10, %9 : vector<2x32xf32>
    %12 = arith.divf %10, %11 : vector<2x32xf32>
    %13 = vector.extract_strided_slice %6 {offsets = [0, 32], sizes = [2, 32], strides = [1, 1]} : vector<2x128xf32> to vector<2x32xf32>
    %14 = arith.negf %13 : vector<2x32xf32>
    %15 = math.exp %14 : vector<2x32xf32>
    %cst_7 = arith.constant 1.000000e+00 : f32
    %16 = vector.broadcast %cst_7 : f32 to vector<2x32xf32>
    %17 = arith.addf %16, %15 : vector<2x32xf32>
    %18 = arith.divf %16, %17 : vector<2x32xf32>
    %19 = vector.extract_strided_slice %6 {offsets = [0, 64], sizes = [2, 32], strides = [1, 1]} : vector<2x128xf32> to vector<2x32xf32>
    %20 = math.tanh %19 : vector<2x32xf32>
    %21 = vector.extract_strided_slice %6 {offsets = [0, 96], sizes = [2, 32], strides = [1, 1]} : vector<2x128xf32> to vector<2x32xf32>
    %22 = arith.negf %21 : vector<2x32xf32>
    %23 = math.exp %22 : vector<2x32xf32>
    %cst_8 = arith.constant 1.000000e+00 : f32
    %24 = vector.broadcast %cst_8 : f32 to vector<2x32xf32>
    %25 = arith.addf %24, %23 : vector<2x32xf32>
    %26 = arith.divf %24, %25 : vector<2x32xf32>
    %27 = arith.mulf %18, %2 : vector<2x32xf32>
    %28 = arith.mulf %12, %20 : vector<2x32xf32>
    %29 = arith.addf %27, %28 : vector<2x32xf32>
    %30 = math.tanh %29 : vector<2x32xf32>
    %31 = arith.mulf %26, %30 : vector<2x32xf32>
    %c0_9 = arith.constant 0 : index
    %c0_10 = arith.constant 0 : index
    %c0_11 = arith.constant 0 : index
    %32 = vector.load %arg3[%c0_9, %c0_10, %c0_11] : memref<2x8x32xf32, #tpu.memory_space<vmem>>, vector<2x1x32xf32>
    %33 = vector.shape_cast %32 : vector<2x1x32xf32> to vector<2x32xf32>
    %34 = vector.shape_cast %31 : vector<2x32xf32> to vector<2x1x32xf32>
    tpu.vector_store %arg3[%c0_9, %c0_10, %c0_11], %34 {strides = array<i32>} : memref<2x8x32xf32, #tpu.memory_space<vmem>>, vector<2x1x32xf32>,
    %c1 = arith.constant 1 : index
    %c0_12 = arith.constant 0 : index
    %c0_13 = arith.constant 0 : index
    %35 = vector.load %arg1[%c1, %c0_12, %c0_13] : memref<8x2x128xf32, #tpu.memory_space<vmem>>, vector<1x2x128xf32>
    %36 = vector.shape_cast %35 : vector<1x2x128xf32> to vector<2x128xf32>
    %cst_14 = arith.constant dense<0.000000e+00> : vector<2x128xf32>
    %37 = tpu.matmul %31, %0, %cst_14 {dimension_numbers = #tpu.dot_dimension_numbers<[1], [0], [0], [1], [0, 0, 1, 1], [], []>} : vector<2x32xf32>, vector<32x128xf32>, vector<2x128xf32> -> vector<2x128xf32>
    %38 = arith.addf %36, %37 : vector<2x128xf32>
    %39 = vector.extract_strided_slice %38 {offsets = [0, 0], sizes = [2, 32], strides = [1, 1]} : vector<2x128xf32> to vector<2x32xf32>
    %40 = arith.negf %39 : vector<2x32xf32>
    %41 = math.exp %40 : vector<2x32xf32>
    %cst_15 = arith.constant 1.000000e+00 : f32
    %42 = vector.broadcast %cst_15 : f32 to vector<2x32xf32>
    %43 = arith.addf %42, %41 : vector<2x32xf32>
    %44 = arith.divf %42, %43 : vector<2x32xf32>
    %45 = vector.extract_strided_slice %38 {offsets = [0, 32], sizes = [2, 32], strides = [1, 1]} : vector<2x128xf32> to vector<2x32xf32>
    %46 = arith.negf %45 : vector<2x32xf32>
    %47 = math.exp %46 : vector<2x32xf32>
    %cst_16 = arith.constant 1.000000e+00 : f32
    %48 = vector.broadcast %cst_16 : f32 to vector<2x32xf32>
    %49 = arith.addf %48, %47 : vector<2x32xf32>
    %50 = arith.divf %48, %49 : vector<2x32xf32>
    %51 = vector.extract_strided_slice %38 {offsets = [0, 64], sizes = [2, 32], strides = [1, 1]} : vector<2x128xf32> to vector<2x32xf32>
    %52 = math.tanh %51 : vector<2x32xf32>
    %53 = vector.extract_strided_slice %38 {offsets = [0, 96], sizes = [2, 32], strides = [1, 1]} : vector<2x128xf32> to vector<2x32xf32>
    %54 = arith.negf %53 : vector<2x32xf32>
    %55 = math.exp %54 : vector<2x32xf32>
    %cst_17 = arith.constant 1.000000e+00 : f32
    %56 = vector.broadcast %cst_17 : f32 to vector<2x32xf32>
    %57 = arith.addf %56, %55 : vector<2x32xf32>
    %58 = arith.divf %56, %57 : vector<2x32xf32>
    %59 = arith.mulf %50, %29 : vector<2x32xf32>
    %60 = arith.mulf %44, %52 : vector<2x32xf32>
    %61 = arith.addf %59, %60 : vector<2x32xf32>
    %62 = math.tanh %61 : vector<2x32xf32>
    %63 = arith.mulf %58, %62 : vector<2x32xf32>
    %c0_18 = arith.constant 0 : index
    %c1_19 = arith.constant 1 : index
    %c0_20 = arith.constant 0 : index
    %64 = vector.load %arg3[%c0_18, %c1_19, %c0_20] : memref<2x8x32xf32, #tpu.memory_space<vmem>>, vector<2x1x32xf32>
    %65 = vector.shape_cast %64 : vector<2x1x32xf32> to vector<2x32xf32>
    %66 = vector.shape_cast %63 : vector<2x32xf32> to vector<2x1x32xf32>
    tpu.vector_store %arg3[%c0_18, %c1_19, %c0_20], %66 {strides = array<i32>} : memref<2x8x32xf32, #tpu.memory_space<vmem>>, vector<2x1x32xf32>,
    %c2 = arith.constant 2 : index
    %c0_21 = arith.constant 0 : index
    %c0_22 = arith.constant 0 : index
    %67 = vector.load %arg1[%c2, %c0_21, %c0_22] : memref<8x2x128xf32, #tpu.memory_space<vmem>>, vector<1x2x128xf32>
    %68 = vector.shape_cast %67 : vector<1x2x128xf32> to vector<2x128xf32>
    %cst_23 = arith.constant dense<0.000000e+00> : vector<2x128xf32>
    %69 = tpu.matmul %63, %0, %cst_23 {dimension_numbers = #tpu.dot_dimension_numbers<[1], [0], [0], [1], [0, 0, 1, 1], [], []>} : vector<2x32xf32>, vector<32x128xf32>, vector<2x128xf32> -> vector<2x128xf32>
    %70 = arith.addf %68, %69 : vector<2x128xf32>
    %71 = vector.extract_strided_slice %70 {offsets = [0, 0], sizes = [2, 32], strides = [1, 1]} : vector<2x128xf32> to vector<2x32xf32>
    %72 = arith.negf %71 : vector<2x32xf32>
    %73 = math.exp %72 : vector<2x32xf32>
    %cst_24 = arith.constant 1.000000e+00 : f32
    %74 = vector.broadcast %cst_24 : f32 to vector<2x32xf32>
    %75 = arith.addf %74, %73 : vector<2x32xf32>
    %76 = arith.divf %74, %75 : vector<2x32xf32>
    %77 = vector.extract_strided_slice %70 {offsets = [0, 32], sizes = [2, 32], strides = [1, 1]} : vector<2x128xf32> to vector<2x32xf32>
    %78 = arith.negf %77 : vector<2x32xf32>
    %79 = math.exp %78 : vector<2x32xf32>
    %cst_25 = arith.constant 1.000000e+00 : f32
    %80 = vector.broadcast %cst_25 : f32 to vector<2x32xf32>
    %81 = arith.addf %80, %79 : vector<2x32xf32>
    %82 = arith.divf %80, %81 : vector<2x32xf32>
    %83 = vector.extract_strided_slice %70 {offsets = [0, 64], sizes = [2, 32], strides = [1, 1]} : vector<2x128xf32> to vector<2x32xf32>
    %84 = math.tanh %83 : vector<2x32xf32>
    %85 = vector.extract_strided_slice %70 {offsets = [0, 96], sizes = [2, 32], strides = [1, 1]} : vector<2x128xf32> to vector<2x32xf32>
    %86 = arith.negf %85 : vector<2x32xf32>
    %87 = math.exp %86 : vector<2x32xf32>
    %cst_26 = arith.constant 1.000000e+00 : f32
    %88 = vector.broadcast %cst_26 : f32 to vector<2x32xf32>
    %89 = arith.addf %88, %87 : vector<2x32xf32>
    %90 = arith.divf %88, %89 : vector<2x32xf32>
    %91 = arith.mulf %82, %61 : vector<2x32xf32>
    %92 = arith.mulf %76, %84 : vector<2x32xf32>
    %93 = arith.addf %91, %92 : vector<2x32xf32>
    %94 = math.tanh %93 : vector<2x32xf32>
    %95 = arith.mulf %90, %94 : vector<2x32xf32>
    %c0_27 = arith.constant 0 : index
    %c2_28 = arith.constant 2 : index
    %c0_29 = arith.constant 0 : index
    %96 = vector.load %arg3[%c0_27, %c2_28, %c0_29] : memref<2x8x32xf32, #tpu.memory_space<vmem>>, vector<2x1x32xf32>
    %97 = vector.shape_cast %96 : vector<2x1x32xf32> to vector<2x32xf32>
    %98 = vector.shape_cast %95 : vector<2x32xf32> to vector<2x1x32xf32>
    tpu.vector_store %arg3[%c0_27, %c2_28, %c0_29], %98 {strides = array<i32>} : memref<2x8x32xf32, #tpu.memory_space<vmem>>, vector<2x1x32xf32>,
    %c3 = arith.constant 3 : index
    %c0_30 = arith.constant 0 : index
    %c0_31 = arith.constant 0 : index
    %99 = vector.load %arg1[%c3, %c0_30, %c0_31] : memref<8x2x128xf32, #tpu.memory_space<vmem>>, vector<1x2x128xf32>
    %100 = vector.shape_cast %99 : vector<1x2x128xf32> to vector<2x128xf32>
    %cst_32 = arith.constant dense<0.000000e+00> : vector<2x128xf32>
    %101 = tpu.matmul %95, %0, %cst_32 {dimension_numbers = #tpu.dot_dimension_numbers<[1], [0], [0], [1], [0, 0, 1, 1], [], []>} : vector<2x32xf32>, vector<32x128xf32>, vector<2x128xf32> -> vector<2x128xf32>
    %102 = arith.addf %100, %101 : vector<2x128xf32>
    %103 = vector.extract_strided_slice %102 {offsets = [0, 0], sizes = [2, 32], strides = [1, 1]} : vector<2x128xf32> to vector<2x32xf32>
    %104 = arith.negf %103 : vector<2x32xf32>
    %105 = math.exp %104 : vector<2x32xf32>
    %cst_33 = arith.constant 1.000000e+00 : f32
    %106 = vector.broadcast %cst_33 : f32 to vector<2x32xf32>
    %107 = arith.addf %106, %105 : vector<2x32xf32>
    %108 = arith.divf %106, %107 : vector<2x32xf32>
    %109 = vector.extract_strided_slice %102 {offsets = [0, 32], sizes = [2, 32], strides = [1, 1]} : vector<2x128xf32> to vector<2x32xf32>
    %110 = arith.negf %109 : vector<2x32xf32>
    %111 = math.exp %110 : vector<2x32xf32>
    %cst_34 = arith.constant 1.000000e+00 : f32
    %112 = vector.broadcast %cst_34 : f32 to vector<2x32xf32>
    %113 = arith.addf %112, %111 : vector<2x32xf32>
    %114 = arith.divf %112, %113 : vector<2x32xf32>
    %115 = vector.extract_strided_slice %102 {offsets = [0, 64], sizes = [2, 32], strides = [1, 1]} : vector<2x128xf32> to vector<2x32xf32>
    %116 = math.tanh %115 : vector<2x32xf32>
    %117 = vector.extract_strided_slice %102 {offsets = [0, 96], sizes = [2, 32], strides = [1, 1]} : vector<2x128xf32> to vector<2x32xf32>
    %118 = arith.negf %117 : vector<2x32xf32>
    %119 = math.exp %118 : vector<2x32xf32>
    %cst_35 = arith.constant 1.000000e+00 : f32
    %120 = vector.broadcast %cst_35 : f32 to vector<2x32xf32>
    %121 = arith.addf %120, %119 : vector<2x32xf32>
    %122 = arith.divf %120, %121 : vector<2x32xf32>
    %123 = arith.mulf %114, %93 : vector<2x32xf32>
    %124 = arith.mulf %108, %116 : vector<2x32xf32>
    %125 = arith.addf %123, %124 : vector<2x32xf32>
    %126 = math.tanh %125 : vector<2x32xf32>
    %127 = arith.mulf %122, %126 : vector<2x32xf32>
    %c0_36 = arith.constant 0 : index
    %c3_37 = arith.constant 3 : index
    %c0_38 = arith.constant 0 : index
    %128 = vector.load %arg3[%c0_36, %c3_37, %c0_38] : memref<2x8x32xf32, #tpu.memory_space<vmem>>, vector<2x1x32xf32>
    %129 = vector.shape_cast %128 : vector<2x1x32xf32> to vector<2x32xf32>
    %130 = vector.shape_cast %127 : vector<2x32xf32> to vector<2x1x32xf32>
    tpu.vector_store %arg3[%c0_36, %c3_37, %c0_38], %130 {strides = array<i32>} : memref<2x8x32xf32, #tpu.memory_space<vmem>>, vector<2x1x32xf32>,
    %c4 = arith.constant 4 : index
    %c0_39 = arith.constant 0 : index
    %c0_40 = arith.constant 0 : index
    %131 = vector.load %arg1[%c4, %c0_39, %c0_40] : memref<8x2x128xf32, #tpu.memory_space<vmem>>, vector<1x2x128xf32>
    %132 = vector.shape_cast %131 : vector<1x2x128xf32> to vector<2x128xf32>
    %cst_41 = arith.constant dense<0.000000e+00> : vector<2x128xf32>
    %133 = tpu.matmul %127, %0, %cst_41 {dimension_numbers = #tpu.dot_dimension_numbers<[1], [0], [0], [1], [0, 0, 1, 1], [], []>} : vector<2x32xf32>, vector<32x128xf32>, vector<2x128xf32> -> vector<2x128xf32>
    %134 = arith.addf %132, %133 : vector<2x128xf32>
    %135 = vector.extract_strided_slice %134 {offsets = [0, 0], sizes = [2, 32], strides = [1, 1]} : vector<2x128xf32> to vector<2x32xf32>
    %136 = arith.negf %135 : vector<2x32xf32>
    %137 = math.exp %136 : vector<2x32xf32>
    %cst_42 = arith.constant 1.000000e+00 : f32
    %138 = vector.broadcast %cst_42 : f32 to vector<2x32xf32>
    %139 = arith.addf %138, %137 : vector<2x32xf32>
    %140 = arith.divf %138, %139 : vector<2x32xf32>
    %141 = vector.extract_strided_slice %134 {offsets = [0, 32], sizes = [2, 32], strides = [1, 1]} : vector<2x128xf32> to vector<2x32xf32>
    %142 = arith.negf %141 : vector<2x32xf32>
    %143 = math.exp %142 : vector<2x32xf32>
    %cst_43 = arith.constant 1.000000e+00 : f32
    %144 = vector.broadcast %cst_43 : f32 to vector<2x32xf32>
    %145 = arith.addf %144, %143 : vector<2x32xf32>
    %146 = arith.divf %144, %145 : vector<2x32xf32>
    %147 = vector.extract_strided_slice %134 {offsets = [0, 64], sizes = [2, 32], strides = [1, 1]} : vector<2x128xf32> to vector<2x32xf32>
    %148 = math.tanh %147 : vector<2x32xf32>
    %149 = vector.extract_strided_slice %134 {offsets = [0, 96], sizes = [2, 32], strides = [1, 1]} : vector<2x128xf32> to vector<2x32xf32>
    %150 = arith.negf %149 : vector<2x32xf32>
    %151 = math.exp %150 : vector<2x32xf32>
    %cst_44 = arith.constant 1.000000e+00 : f32
    %152 = vector.broadcast %cst_44 : f32 to vector<2x32xf32>
    %153 = arith.addf %152, %151 : vector<2x32xf32>
    %154 = arith.divf %152, %153 : vector<2x32xf32>
    %155 = arith.mulf %146, %125 : vector<2x32xf32>
    %156 = arith.mulf %140, %148 : vector<2x32xf32>
    %157 = arith.addf %155, %156 : vector<2x32xf32>
    %158 = math.tanh %157 : vector<2x32xf32>
    %159 = arith.mulf %154, %158 : vector<2x32xf32>
    %c0_45 = arith.constant 0 : index
    %c4_46 = arith.constant 4 : index
    %c0_47 = arith.constant 0 : index
    %160 = vector.load %arg3[%c0_45, %c4_46, %c0_47] : memref<2x8x32xf32, #tpu.memory_space<vmem>>, vector<2x1x32xf32>
    %161 = vector.shape_cast %160 : vector<2x1x32xf32> to vector<2x32xf32>
    %162 = vector.shape_cast %159 : vector<2x32xf32> to vector<2x1x32xf32>
    tpu.vector_store %arg3[%c0_45, %c4_46, %c0_47], %162 {strides = array<i32>} : memref<2x8x32xf32, #tpu.memory_space<vmem>>, vector<2x1x32xf32>,
    %c5 = arith.constant 5 : index
    %c0_48 = arith.constant 0 : index
    %c0_49 = arith.constant 0 : index
    %163 = vector.load %arg1[%c5, %c0_48, %c0_49] : memref<8x2x128xf32, #tpu.memory_space<vmem>>, vector<1x2x128xf32>
    %164 = vector.shape_cast %163 : vector<1x2x128xf32> to vector<2x128xf32>
    %cst_50 = arith.constant dense<0.000000e+00> : vector<2x128xf32>
    %165 = tpu.matmul %159, %0, %cst_50 {dimension_numbers = #tpu.dot_dimension_numbers<[1], [0], [0], [1], [0, 0, 1, 1], [], []>} : vector<2x32xf32>, vector<32x128xf32>, vector<2x128xf32> -> vector<2x128xf32>
    %166 = arith.addf %164, %165 : vector<2x128xf32>
    %167 = vector.extract_strided_slice %166 {offsets = [0, 0], sizes = [2, 32], strides = [1, 1]} : vector<2x128xf32> to vector<2x32xf32>
    %168 = arith.negf %167 : vector<2x32xf32>
    %169 = math.exp %168 : vector<2x32xf32>
    %cst_51 = arith.constant 1.000000e+00 : f32
    %170 = vector.broadcast %cst_51 : f32 to vector<2x32xf32>
    %171 = arith.addf %170, %169 : vector<2x32xf32>
    %172 = arith.divf %170, %171 : vector<2x32xf32>
    %173 = vector.extract_strided_slice %166 {offsets = [0, 32], sizes = [2, 32], strides = [1, 1]} : vector<2x128xf32> to vector<2x32xf32>
    %174 = arith.negf %173 : vector<2x32xf32>
    %175 = math.exp %174 : vector<2x32xf32>
    %cst_52 = arith.constant 1.000000e+00 : f32
    %176 = vector.broadcast %cst_52 : f32 to vector<2x32xf32>
    %177 = arith.addf %176, %175 : vector<2x32xf32>
    %178 = arith.divf %176, %177 : vector<2x32xf32>
    %179 = vector.extract_strided_slice %166 {offsets = [0, 64], sizes = [2, 32], strides = [1, 1]} : vector<2x128xf32> to vector<2x32xf32>
    %180 = math.tanh %179 : vector<2x32xf32>
    %181 = vector.extract_strided_slice %166 {offsets = [0, 96], sizes = [2, 32], strides = [1, 1]} : vector<2x128xf32> to vector<2x32xf32>
    %182 = arith.negf %181 : vector<2x32xf32>
    %183 = math.exp %182 : vector<2x32xf32>
    %cst_53 = arith.constant 1.000000e+00 : f32
    %184 = vector.broadcast %cst_53 : f32 to vector<2x32xf32>
    %185 = arith.addf %184, %183 : vector<2x32xf32>
    %186 = arith.divf %184, %185 : vector<2x32xf32>
    %187 = arith.mulf %178, %157 : vector<2x32xf32>
    %188 = arith.mulf %172, %180 : vector<2x32xf32>
    %189 = arith.addf %187, %188 : vector<2x32xf32>
    %190 = math.tanh %189 : vector<2x32xf32>
    %191 = arith.mulf %186, %190 : vector<2x32xf32>
    %c0_54 = arith.constant 0 : index
    %c5_55 = arith.constant 5 : index
    %c0_56 = arith.constant 0 : index
    %192 = vector.load %arg3[%c0_54, %c5_55, %c0_56] : memref<2x8x32xf32, #tpu.memory_space<vmem>>, vector<2x1x32xf32>
    %193 = vector.shape_cast %192 : vector<2x1x32xf32> to vector<2x32xf32>
    %194 = vector.shape_cast %191 : vector<2x32xf32> to vector<2x1x32xf32>
    tpu.vector_store %arg3[%c0_54, %c5_55, %c0_56], %194 {strides = array<i32>} : memref<2x8x32xf32, #tpu.memory_space<vmem>>, vector<2x1x32xf32>,
    %c6 = arith.constant 6 : index
    %c0_57 = arith.constant 0 : index
    %c0_58 = arith.constant 0 : index
    %195 = vector.load %arg1[%c6, %c0_57, %c0_58] : memref<8x2x128xf32, #tpu.memory_space<vmem>>, vector<1x2x128xf32>
    %196 = vector.shape_cast %195 : vector<1x2x128xf32> to vector<2x128xf32>
    %cst_59 = arith.constant dense<0.000000e+00> : vector<2x128xf32>
    %197 = tpu.matmul %191, %0, %cst_59 {dimension_numbers = #tpu.dot_dimension_numbers<[1], [0], [0], [1], [0, 0, 1, 1], [], []>} : vector<2x32xf32>, vector<32x128xf32>, vector<2x128xf32> -> vector<2x128xf32>
    %198 = arith.addf %196, %197 : vector<2x128xf32>
    %199 = vector.extract_strided_slice %198 {offsets = [0, 0], sizes = [2, 32], strides = [1, 1]} : vector<2x128xf32> to vector<2x32xf32>
    %200 = arith.negf %199 : vector<2x32xf32>
    %201 = math.exp %200 : vector<2x32xf32>
    %cst_60 = arith.constant 1.000000e+00 : f32
    %202 = vector.broadcast %cst_60 : f32 to vector<2x32xf32>
    %203 = arith.addf %202, %201 : vector<2x32xf32>
    %204 = arith.divf %202, %203 : vector<2x32xf32>
    %205 = vector.extract_strided_slice %198 {offsets = [0, 32], sizes = [2, 32], strides = [1, 1]} : vector<2x128xf32> to vector<2x32xf32>
    %206 = arith.negf %205 : vector<2x32xf32>
    %207 = math.exp %206 : vector<2x32xf32>
    %cst_61 = arith.constant 1.000000e+00 : f32
    %208 = vector.broadcast %cst_61 : f32 to vector<2x32xf32>
    %209 = arith.addf %208, %207 : vector<2x32xf32>
    %210 = arith.divf %208, %209 : vector<2x32xf32>
    %211 = vector.extract_strided_slice %198 {offsets = [0, 64], sizes = [2, 32], strides = [1, 1]} : vector<2x128xf32> to vector<2x32xf32>
    %212 = math.tanh %211 : vector<2x32xf32>
    %213 = vector.extract_strided_slice %198 {offsets = [0, 96], sizes = [2, 32], strides = [1, 1]} : vector<2x128xf32> to vector<2x32xf32>
    %214 = arith.negf %213 : vector<2x32xf32>
    %215 = math.exp %214 : vector<2x32xf32>
    %cst_62 = arith.constant 1.000000e+00 : f32
    %216 = vector.broadcast %cst_62 : f32 to vector<2x32xf32>
    %217 = arith.addf %216, %215 : vector<2x32xf32>
    %218 = arith.divf %216, %217 : vector<2x32xf32>
    %219 = arith.mulf %210, %189 : vector<2x32xf32>
    %220 = arith.mulf %204, %212 : vector<2x32xf32>
    %221 = arith.addf %219, %220 : vector<2x32xf32>
    %222 = math.tanh %221 : vector<2x32xf32>
    %223 = arith.mulf %218, %222 : vector<2x32xf32>
    %c0_63 = arith.constant 0 : index
    %c6_64 = arith.constant 6 : index
    %c0_65 = arith.constant 0 : index
    %224 = vector.load %arg3[%c0_63, %c6_64, %c0_65] : memref<2x8x32xf32, #tpu.memory_space<vmem>>, vector<2x1x32xf32>
    %225 = vector.shape_cast %224 : vector<2x1x32xf32> to vector<2x32xf32>
    %226 = vector.shape_cast %223 : vector<2x32xf32> to vector<2x1x32xf32>
    tpu.vector_store %arg3[%c0_63, %c6_64, %c0_65], %226 {strides = array<i32>} : memref<2x8x32xf32, #tpu.memory_space<vmem>>, vector<2x1x32xf32>,
    %c7 = arith.constant 7 : index
    %c0_66 = arith.constant 0 : index
    %c0_67 = arith.constant 0 : index
    %227 = vector.load %arg1[%c7, %c0_66, %c0_67] : memref<8x2x128xf32, #tpu.memory_space<vmem>>, vector<1x2x128xf32>
    %228 = vector.shape_cast %227 : vector<1x2x128xf32> to vector<2x128xf32>
    %cst_68 = arith.constant dense<0.000000e+00> : vector<2x128xf32>
    %229 = tpu.matmul %223, %0, %cst_68 {dimension_numbers = #tpu.dot_dimension_numbers<[1], [0], [0], [1], [0, 0, 1, 1], [], []>} : vector<2x32xf32>, vector<32x128xf32>, vector<2x128xf32> -> vector<2x128xf32>
    %230 = arith.addf %228, %229 : vector<2x128xf32>
    %231 = vector.extract_strided_slice %230 {offsets = [0, 0], sizes = [2, 32], strides = [1, 1]} : vector<2x128xf32> to vector<2x32xf32>
    %232 = arith.negf %231 : vector<2x32xf32>
    %233 = math.exp %232 : vector<2x32xf32>
    %cst_69 = arith.constant 1.000000e+00 : f32
    %234 = vector.broadcast %cst_69 : f32 to vector<2x32xf32>
    %235 = arith.addf %234, %233 : vector<2x32xf32>
    %236 = arith.divf %234, %235 : vector<2x32xf32>
    %237 = vector.extract_strided_slice %230 {offsets = [0, 32], sizes = [2, 32], strides = [1, 1]} : vector<2x128xf32> to vector<2x32xf32>
    %238 = arith.negf %237 : vector<2x32xf32>
    %239 = math.exp %238 : vector<2x32xf32>
    %cst_70 = arith.constant 1.000000e+00 : f32
    %240 = vector.broadcast %cst_70 : f32 to vector<2x32xf32>
    %241 = arith.addf %240, %239 : vector<2x32xf32>
    %242 = arith.divf %240, %241 : vector<2x32xf32>
    %243 = vector.extract_strided_slice %230 {offsets = [0, 64], sizes = [2, 32], strides = [1, 1]} : vector<2x128xf32> to vector<2x32xf32>
    %244 = math.tanh %243 : vector<2x32xf32>
    %245 = vector.extract_strided_slice %230 {offsets = [0, 96], sizes = [2, 32], strides = [1, 1]} : vector<2x128xf32> to vector<2x32xf32>
    %246 = arith.negf %245 : vector<2x32xf32>
    %247 = math.exp %246 : vector<2x32xf32>
    %cst_71 = arith.constant 1.000000e+00 : f32
    %248 = vector.broadcast %cst_71 : f32 to vector<2x32xf32>
    %249 = arith.addf %248, %247 : vector<2x32xf32>
    %250 = arith.divf %248, %249 : vector<2x32xf32>
    %251 = arith.mulf %242, %221 : vector<2x32xf32>
    %252 = arith.mulf %236, %244 : vector<2x32xf32>
    %253 = arith.addf %251, %252 : vector<2x32xf32>
    %254 = math.tanh %253 : vector<2x32xf32>
    %255 = arith.mulf %250, %254 : vector<2x32xf32>
    %c0_72 = arith.constant 0 : index
    %c7_73 = arith.constant 7 : index
    %c0_74 = arith.constant 0 : index
    %256 = vector.load %arg3[%c0_72, %c7_73, %c0_74] : memref<2x8x32xf32, #tpu.memory_space<vmem>>, vector<2x1x32xf32>
    %257 = vector.shape_cast %256 : vector<2x1x32xf32> to vector<2x32xf32>
    %258 = vector.shape_cast %255 : vector<2x32xf32> to vector<2x1x32xf32>
    tpu.vector_store %arg3[%c0_72, %c7_73, %c0_74], %258 {strides = array<i32>} : memref<2x8x32xf32, #tpu.memory_space<vmem>>, vector<2x1x32xf32>,
    return
  }
  func.func @transform_0(%arg0: i32) -> (i32, i32, i32) {
    %c0_i32 = arith.constant 0 : i32
    %c0_i32_0 = arith.constant 0 : i32
    %c0_i32_1 = arith.constant 0 : i32
    %c0_i32_2 = arith.constant 0 : i32
    return %c0_i32, %c0_i32_0, %c0_i32_1 : i32, i32, i32
  }
  func.func @transform_1(%arg0: i32) -> (i32, i32) {
    %c0_i32 = arith.constant 0 : i32
    %c0_i32_0 = arith.constant 0 : i32
    %c0_i32_1 = arith.constant 0 : i32
    return %c0_i32, %c0_i32_0 : i32, i32
  }
  func.func @transform_2(%arg0: i32) -> (i32, i32, i32) {
    %c0_i32 = arith.constant 0 : i32
    %c0_i32_0 = arith.constant 0 : i32
    %c0_i32_1 = arith.constant 0 : i32
    %c0_i32_2 = arith.constant 0 : i32
    return %c0_i32, %c0_i32_0, %c0_i32_1 : i32, i32, i32
  }
}

</mosaic_0001>

<bundles_post_ra>
// kernel: encoder_forward.1
= control target key start
LH: loop header
LB: loop body
LE: loop exit
PB: predicated region body
PF: predicated region fallthrough
CT: control target
= control target key end

     0   :  { %v1396_v1 = vmov 0.0   ;;  %vm1397_vm0 = vmmov 0   ;;  %s1690_s0 = inlined_call_operand.vmem [shape: f32[8,2,128], index: 0, kind: input, shape index: {}]   ;;  %s1691_s1 = inlined_call_operand.vmem [shape: f32[32,128], index: 1, kind: input, shape index: {}]   ;;  %s1692_s2 = inlined_call_operand.hbm [shape: f32[2,8,32], index: 2, kind: output, shape index: {}]  }
   0x1   :  { %v1422_v0 = vld [vmem:[%s1691_s1 + $0x18] sm:$0xff]  ;;  %1214 = vmatprep.subr.mxu0 %v1396_v1  ;;  %v1428_v2 = vld [vmem:[%s1691_s1 + $0x10] sm:$0xff]  ;;  %1222 = vmatprep.mubr.msk.f32.mxu0 %vm1397_vm0, %v1396_v1 }
   0x2   :  { %7 = vsyncpa [#allocation3], 0  ;;  %1215 = vmatpush3.msra.mxu0 %v1422_v0  ;;  %1225 = vmatprep.subr.mxu1 %v1396_v1  ;;  %v1438_v3 = vld [vmem:[%s1691_s1 + $0x8] sm:$0xff]  ;;  %v1447_v4 = vld [vmem:[%s1691_s1] sm:$0xff]  ;;  %s1398_s18 = smov 64   ;;  %s1399_s19 = smov 32  }
   0x3   :  { %1216 = vmatprep.subr.mxu0 %v1396_v1  ;;  %1226 = vmatpush3.msra.mxu1 %v1422_v0  ;;  %v16_v5 = vld [vmem:[%s1690_s0] sm:$0x3]  ;;  %vm17_vm1 = vcmask 261120   ;;  %v1153_v23 = vld [vmem:[%s1690_s0 + $0x2] sm:$0x3]  ;;  %vm153_vm2 = vcmask 253952  }
   0x4   :  { %1217 = vmatpush3.msra.mxu0 %v1428_v2  ;;  %1227 = vmatprep.subr.mxu1 %v1396_v1  ;;  %v1156_v41 = vld [vmem:[%s1690_s0 + $0x4] sm:$0x3]  ;;  %v1159_v59 = vld [vmem:[%s1690_s0 + $0x6] sm:$0x3] }
   0x5   :  { %1218 = vmatprep.subr.mxu0 %v1396_v1  ;;  %1228 = vmatpush3.msra.mxu1 %v1428_v2 }
   0x6   :  { %1219 = vmatpush3.msra.mxu0 %v1438_v3  ;;  %1229 = vmatprep.subr.mxu1 %v1396_v1 }
   0x7   :  { %1220 = vmatprep.subr.mxu0 %v1396_v1  ;;  %1230 = vmatpush3.msra.mxu1 %v1438_v3 }
   0x8   :  { %1221 = vmatpush3.msra.mxu0 %v1447_v4  ;;  %1231 = vmatprep.subr.mxu1 %v1396_v1 }
   0x9   :  { %1223 = vmatmul.mubr.f32.vlgmr.msra.gmra.mxu0 %v1396_v1  ;;  %1232 = vmatpush3.msra.mxu1 %v1447_v4 }
   0xa   :  { %1233 = vmatprep.mubr.msk.f32.mxu1 %vm1397_vm0, %v1396_v1  ;;  %1236 = vmatprep.subr.mxu0 %v1396_v1 }
   0xb   :  { %1237 = vmatpush3.msra.mxu0 %v1422_v0  ;;  %1244 = vmatprep.mubr.msk.f32.mxu0 %vm1397_vm0, %v1396_v1 }
   0xc   :  { %1238 = vmatprep.subr.mxu0 %v1396_v1  ;;  %1247 = vmatprep.subr.mxu1 %v1396_v1 }
   0xd   :  { %1239 = vmatpush3.msra.mxu0 %v1428_v2 }
   0xe   :  { %1240 = vmatprep.subr.mxu0 %v1396_v1 }
   0xf   :  { %1241 = vmatpush3.msra.mxu0 %v1438_v3 }
  0x10   :  { %1242 = vmatprep.subr.mxu0 %v1396_v1 }
  0x11   :  { %1243 = vmatpush3.msra.mxu0 %v1447_v4 }
  0x12   :  { %1258 = vmatprep.subr.mxu0 %v1396_v1 }
  0xc9   :  { %v87_v6 = vpop.f32.mrf.mxu0 }
  0xca   :  { %v91_v7 = vadd.f32 %v87_v6, %v16_v5 }
  0xcb   :  { %v1224_v8 = vpop.f32.mrf.mxu0 }
  0xcc   :  { %1310 = vtanh.f32 %v91_v7  ;;  %v1152_v10 = vmul.f32 -1.442695, %v91_v7 }
  0xce   :  { %1312 = vpow2.f32 %v1152_v10 }
  0xd9   :  { %v1311_v9 = vpop.eup %1310 }
  0xda   :  { %101 = vrot.lane.b32.xlu0 %v1311_v9, %s1398_s18 }
  0xdb   :  { %v1313_v11 = vpop.eup %1312 }
  0xdc   :  { %v95_v12 = vadd.f32 1.0, %v1313_v11 }
  0xde   :  { %1314 = vrcp.f32 %v95_v12 }
  0xeb   :  { %v1315_v13 = vpop.eup %1314 }
  0xec   :  { %v99_v16 = vmul.f32 0.0, %v1315_v13 }
 0x14c   :  { %v102_v14 = vpop.permute.xlu0 %101 }
 0x14d   :  { %v104_v15 = vmul.f32 %v1315_v13, %v102_v14 }
 0x14f   :  { %106 = vrot.lane.b32.xlu0 %v104_v15, %s1399_s19 }
 0x1c1   :  { %v107_v17 = vpop.permute.xlu0 %106 }
 0x1c2   :  { %v109_v18 = vadd.f32 %v107_v17, %v99_v16 }
 0x1c4   :  { %1316 = vtanh.f32 %v109_v18 }
 0x1d1   :  { %v1317_v19 = vpop.eup %1316 }
 0x1d2   :  { %112 = vrot.lane.b32.xlu1 %v1317_v19, %s1398_s18 }
 0x244   :  { %v113_v20 = vpop.permute.xlu1 %112 }
 0x245   :  { %v1478_v21 = vmul.f32 %v1315_v13, %v113_v20 }
 0x247   :  { %158 = vrot.lane.b32.xlu1 %v1478_v21, %s1399_s19 }
 0x2b9   :  { %v159_v22 = vpop.permute.xlu1 %158 }
 0x2ba   :  { %1234 = vmatmul.mubr.msk.f32.vlgmr.msra.gmra.mxu1 %vm17_vm1, %v159_v22 }
 0x2bb   :  { %1248 = vmatpush3.msra.mxu1 %v1422_v0  ;;  %1255 = vmatprep.mubr.msk.f32.mxu1 %vm1397_vm0, %v1396_v1 }
 0x2bc   :  { %1249 = vmatprep.subr.mxu1 %v1396_v1 }
 0x2bd   :  { %1250 = vmatpush3.msra.mxu1 %v1428_v2 }
 0x2be   :  { %1251 = vmatprep.subr.mxu1 %v1396_v1 }
 0x2bf   :  { %1252 = vmatpush3.msra.mxu1 %v1438_v3 }
 0x2c0   :  { %1253 = vmatprep.subr.mxu1 %v1396_v1 }
 0x2c1   :  { %1254 = vmatpush3.msra.mxu1 %v1447_v4 }
 0x2c2   :  { %1269 = vmatprep.subr.mxu1 %v1396_v1 }
 0x37a   :  { %v228_v24 = vpop.f32.mrf.mxu1 }
 0x37b   :  { %v232_v25 = vadd.f32 %v1153_v23, %v228_v24 }
 0x37c   :  { %v1235_v26 = vpop.f32.mrf.mxu1 }
 0x37d   :  { %1318 = vtanh.f32 %v232_v25  ;;  %v1155_v28 = vmul.f32 -1.442695, %v232_v25 }
 0x37f   :  { %1320 = vpow2.f32 %v1155_v28 }
 0x38a   :  { %v1319_v27 = vpop.eup %1318 }
 0x38b   :  { %242 = vrot.lane.b32.xlu0 %v1319_v27, %s1398_s18 }
 0x38c   :  { %v1321_v29 = vpop.eup %1320 }
 0x38d   :  { %v236_v30 = vadd.f32 1.0, %v1321_v29 }
 0x38f   :  { %1322 = vrcp.f32 %v236_v30 }
 0x39c   :  { %v1323_v31 = vpop.eup %1322 }
 0x39d   :  { %v240_v34 = vmul.f32 %v1323_v31, %v109_v18  ;;  %v1162_v18 = vld [vmem:[%s1690_s0 + $0x8] sm:$0x3] }
 0x3fd   :  { %v243_v32 = vpop.permute.xlu0 %242 }
 0x3fe   :  { %v245_v33 = vmul.f32 %v1323_v31, %v243_v32 }
 0x400   :  { %247 = vrot.lane.b32.xlu1 %v245_v33, %s1399_s19 }
 0x472   :  { %v248_v35 = vpop.permute.xlu1 %247 }
 0x473   :  { %v250_v36 = vadd.f32 %v248_v35, %v240_v34 }
 0x475   :  { %1324 = vtanh.f32 %v250_v36 }
 0x482   :  { %v1325_v37 = vpop.eup %1324 }
 0x483   :  { %253 = vrot.lane.b32.xlu0 %v1325_v37, %s1398_s18  ;;  %v1165_v37 = vld [vmem:[%s1690_s0 + $0xa] sm:$0x3] }
 0x4f5   :  { %v254_v38 = vpop.permute.xlu0 %253 }
 0x4f6   :  { %v1499_v39 = vmul.f32 %v1323_v31, %v254_v38 }
 0x4f8   :  { %298 = vrot.lane.b32.xlu1 %v1499_v39, %s1399_s19 }
 0x56a   :  { %v299_v40 = vpop.permute.xlu1 %298 }
 0x56b   :  { %1245 = vmatmul.mubr.msk.f32.vlgmr.msra.gmra.mxu0 %vm17_vm1, %v299_v40 }
 0x56c   :  { %1259 = vmatpush3.msra.mxu0 %v1422_v0  ;;  %1266 = vmatprep.mubr.msk.f32.mxu0 %vm1397_vm0, %v1396_v1 }
 0x56d   :  { %1260 = vmatprep.subr.mxu0 %v1396_v1 }
 0x56e   :  { %1261 = vmatpush3.msra.mxu0 %v1428_v2 }
 0x56f   :  { %1262 = vmatprep.subr.mxu0 %v1396_v1 }
 0x570   :  { %1263 = vmatpush3.msra.mxu0 %v1438_v3 }
 0x571   :  { %1264 = vmatprep.subr.mxu0 %v1396_v1 }
 0x572   :  { %1265 = vmatpush3.msra.mxu0 %v1447_v4 }
 0x573   :  { %1280 = vmatprep.subr.mxu0 %v1396_v1 }
 0x62b   :  { %v368_v42 = vpop.f32.mrf.mxu0 }
 0x62c   :  { %v372_v43 = vadd.f32 %v1156_v41, %v368_v42 }
 0x62d   :  { %v1246_v44 = vpop.f32.mrf.mxu0 }
 0x62e   :  { %1326 = vtanh.f32 %v372_v43  ;;  %v1158_v46 = vmul.f32 -1.442695, %v372_v43 }
 0x630   :  { %1328 = vpow2.f32 %v1158_v46 }
 0x63b   :  { %v1327_v45 = vpop.eup %1326 }
 0x63c   :  { %382 = vrot.lane.b32.xlu0 %v1327_v45, %s1398_s18 }
 0x63d   :  { %v1329_v47 = vpop.eup %1328 }
 0x63e   :  { %v376_v48 = vadd.f32 1.0, %v1329_v47 }
 0x640   :  { %1330 = vrcp.f32 %v376_v48 }
 0x64d   :  { %v1331_v49 = vpop.eup %1330 }
 0x64e   :  { %v380_v52 = vmul.f32 %v1331_v49, %v250_v36 }
 0x6ae   :  { %v383_v50 = vpop.permute.xlu0 %382 }
 0x6af   :  { %v385_v51 = vmul.f32 %v1331_v49, %v383_v50 }
 0x6b1   :  { %387 = vrot.lane.b32.xlu1 %v385_v51, %s1399_s19  ;;  %v1168_v51 = vld [vmem:[%s1690_s0 + $0xc] sm:$0x3] }
 0x723   :  { %v388_v53 = vpop.permute.xlu1 %387 }
 0x724   :  { %v390_v54 = vadd.f32 %v388_v53, %v380_v52 }
 0x726   :  { %1332 = vtanh.f32 %v390_v54 }
 0x733   :  { %v1333_v55 = vpop.eup %1332 }
 0x734   :  { %393 = vrot.lane.b32.xlu0 %v1333_v55, %s1398_s18 }
 0x7a6   :  { %v394_v56 = vpop.permute.xlu0 %393 }
 0x7a7   :  { %v1520_v57 = vmul.f32 %v1331_v49, %v394_v56 }
 0x7a9   :  { %438 = vrot.lane.b32.xlu1 %v1520_v57, %s1399_s19 }
 0x81b   :  { %v439_v58 = vpop.permute.xlu1 %438 }
 0x81c   :  { %1256 = vmatmul.mubr.msk.f32.vlgmr.msra.gmra.mxu1 %vm17_vm1, %v439_v58 }
 0x81d   :  { %1270 = vmatpush3.msra.mxu1 %v1422_v0  ;;  %1277 = vmatprep.mubr.msk.f32.mxu1 %vm1397_vm0, %v1396_v1 }
 0x81e   :  { %1271 = vmatprep.subr.mxu1 %v1396_v1 }
 0x81f   :  { %1272 = vmatpush3.msra.mxu1 %v1428_v2 }
 0x820   :  { %1273 = vmatprep.subr.mxu1 %v1396_v1 }
 0x821   :  { %1274 = vmatpush3.msra.mxu1 %v1438_v3 }
 0x822   :  { %1275 = vmatprep.subr.mxu1 %v1396_v1 }
 0x823   :  { %1276 = vmatpush3.msra.mxu1 %v1447_v4 }
 0x824   :  { %1291 = vmatprep.subr.mxu1 %v1396_v1 }
 0x8dc   :  { %v508_v60 = vpop.f32.mrf.mxu1 }
 0x8dd   :  { %v512_v61 = vadd.f32 %v1159_v59, %v508_v60 }
 0x8de   :  { %v1257_v62 = vpop.f32.mrf.mxu1 }
 0x8df   :  { %1334 = vtanh.f32 %v512_v61  ;;  %v1161_v5 = vmul.f32 -1.442695, %v512_v61 }
 0x8e1   :  { %1336 = vpow2.f32 %v1161_v5 }
 0x8ec   :  { %v1335_v63 = vpop.eup %1334 }
 0x8ed   :  { %522 = vrot.lane.b32.xlu0 %v1335_v63, %s1398_s18 }
 0x8ee   :  { %v1337_v6 = vpop.eup %1336 }
 0x8ef   :  { %v516_v7 = vadd.f32 1.0, %v1337_v6 }
 0x8f1   :  { %1338 = vrcp.f32 %v516_v7 }
 0x8fe   :  { %v1339_v8 = vpop.eup %1338 }
 0x8ff   :  { %v520_v11 = vmul.f32 %v1339_v8, %v390_v54 }
 0x95f   :  { %v523_v9 = vpop.permute.xlu0 %522 }
 0x960   :  { %v525_v10 = vmul.f32 %v1339_v8, %v523_v9 }
 0x962   :  { %527 = vrot.lane.b32.xlu1 %v525_v10, %s1399_s19 }
 0x9d4   :  { %v528_v12 = vpop.permute.xlu1 %527 }
 0x9d5   :  { %v530_v13 = vadd.f32 %v528_v12, %v520_v11  ;;  %v1171_v11 = vld [vmem:[%s1690_s0 + $0xe] sm:$0x3]  ;;  %s1401_s0 = smov [#allocation2]  }
 0x9d6   :  { %s1141_s6 = sshll.u32 %s1401_s0, 4  ;;  %s1142_s6 = int_to_ptr.vmem [resolvable:$true] %s1141_s6 }
 0x9d7   :  { %1340 = vtanh.f32 %v530_v13  ;;  %s1374_s7 = scalar_lea.vmem %s1142_s6, 256  ;;  %p1379_p1 = scmp.lt.s32.totalorder %s1142_s6, %s1142_s6 }
 0x9d8   :  { %p1375_p0 = scmp.ne.s32.totalorder %s1142_s6, %s1374_s7  ;;  %p1380_p2 = scmp.lt.s32.totalorder %s1374_s7, %s1374_s7 }
 0x9da   :  { %p1381_p3 = por %p1380_p2, %p1379_p1 }
 0x9dc   :  { %p1382_p4 = pnand %p1381_p3, %p1375_p0 }
 0x9e4   :  { %v1341_v14 = vpop.eup %1340 }
 0x9e5   :  { %533 = vrot.lane.b32.xlu0 %v1341_v14, %s1398_s18 }
 0xa57   :  { %v534_v15 = vpop.permute.xlu0 %533 }
 0xa58   :  { %v1541_v16 = vmul.f32 %v1339_v8, %v534_v15 }
 0xa5a   :  { %578 = vrot.lane.b32.xlu1 %v1541_v16, %s1399_s19 }
 0xacc   :  { %v579_v17 = vpop.permute.xlu1 %578 }
 0xacd   :  { %1267 = vmatmul.mubr.msk.f32.vlgmr.msra.gmra.mxu0 %vm17_vm1, %v579_v17 }
 0xace   :  { %1281 = vmatpush3.msra.mxu0 %v1422_v0  ;;  %1288 = vmatprep.mubr.msk.f32.mxu0 %vm1397_vm0, %v1396_v1 }
 0xacf   :  { %1282 = vmatprep.subr.mxu0 %v1396_v1 }
 0xad0   :  { %1283 = vmatpush3.msra.mxu0 %v1428_v2 }
 0xad1   :  { %1284 = vmatprep.subr.mxu0 %v1396_v1 }
 0xad2   :  { %1285 = vmatpush3.msra.mxu0 %v1438_v3 }
 0xad3   :  { %1286 = vmatprep.subr.mxu0 %v1396_v1 }
 0xad4   :  { %1287 = vmatpush3.msra.mxu0 %v1447_v4 }
 0xb8d   :  { %v648_v19 = vpop.f32.mrf.mxu0 }
 0xb8e   :  { %v652_v20 = vadd.f32 %v1162_v18, %v648_v19 }
 0xb8f   :  { %v1268_v22 = vpop.f32.mrf.mxu0 }
 0xb90   :  { %1342 = vtanh.f32 %v652_v20  ;;  %v1164_v24 = vmul.f32 -1.442695, %v652_v20  ;;  %v1400_v20 = vmov 1966171168  }
 0xb91   :  { %v118_v22 = vunpack.c.l.s4 %v1400_v20 }
 0xb92   :  { %1344 = vpow2.f32 %v1164_v24 }
 0xb93   :  { %v119_v24 = vunpack.c.0.s8 %v118_v22 }
 0xb9d   :  { %v1343_v23 = vpop.eup %1342 }
 0xb9e   :  { %662 = vrot.lane.b32.xlu0 %v1343_v23, %s1398_s18  ;;  %v120_v23 = vlaneseq }
 0xb9f   :  { %v1345_v25 = vpop.eup %1344 }
 0xba0   :  { %v656_v26 = vadd.f32 1.0, %v1345_v25  ;;  %v121_v25 = vshrl.u32 %v120_v23, 7 }
 0xba2   :  { %1346 = vrcp.f32 %v656_v26  ;;  %v1598_v26 = vsub.s32 %v119_v24, %v121_v25 }
 0xbaf   :  { %v1347_v27 = vpop.eup %1346 }
 0xbb0   :  { %v660_v30 = vmul.f32 %v1347_v27, %v530_v13 }
 0xc10   :  { %v663_v28 = vpop.permute.xlu0 %662 }
 0xc11   :  { %v665_v29 = vmul.f32 %v1347_v27, %v663_v28 }
 0xc13   :  { %667 = vrot.lane.b32.xlu1 %v665_v29, %s1399_s19 }
 0xc85   :  { %v668_v31 = vpop.permute.xlu1 %667 }
 0xc86   :  { %v670_v32 = vadd.f32 %v668_v31, %v660_v30  ;;  %v264_v31 = vrot.slane %v1499_v39, %v1598_v26  ;;  %v544_v39 = vrot.slane %v1541_v16, %v1598_v26 }
 0xc88   :  { %1348 = vtanh.f32 %v670_v32 }
 0xc95   :  { %v1349_v33 = vpop.eup %1348 }
 0xc96   :  { %673 = vrot.lane.b32.xlu0 %v1349_v33, %s1398_s18  ;;  %v1608_v33 = vsub.s32 0, %v121_v25 }
 0xd08   :  { %v674_v34 = vpop.permute.xlu0 %673 }
 0xd09   :  { %v1561_v35 = vmul.f32 %v1347_v27, %v674_v34  ;;  %v123_v27 = vrot.slane %v1478_v21, %v1598_v26  ;;  %v272_v34 = vrot.slane %v264_v31, %v1598_v26 }
 0xd0b   :  { %718 = vrot.lane.b32.xlu1 %v1561_v35, %s1399_s19  ;;  %v131_v30 = vrot.slane %v123_v27, %v1598_v26 }
 0xd0d   :  { %v142_v21 = vrot.slane %v131_v30, %v1608_v33 }
 0xd7d   :  { %v719_v36 = vpop.permute.xlu1 %718 }
 0xd7e   :  { %1278 = vmatmul.mubr.msk.f32.vlgmr.msra.gmra.mxu1 %vm17_vm1, %v719_v36  ;;  %v404_v36 = vrot.slane %v1520_v57, %v1598_v26 }
 0xd7f   :  { %1292 = vmatpush3.msra.mxu1 %v1422_v0  ;;  %1299 = vmatprep.mubr.msk.f32.mxu1 %vm1397_vm0, %v1396_v1 }
 0xd80   :  { %1293 = vmatprep.subr.mxu1 %v1396_v1 }
 0xd81   :  { %1294 = vmatpush3.msra.mxu1 %v1428_v2 }
 0xd82   :  { %1295 = vmatprep.subr.mxu1 %v1396_v1 }
 0xd83   :  { %1296 = vmatpush3.msra.mxu1 %v1438_v3 }
 0xd84   :  { %1297 = vmatprep.subr.mxu1 %v1396_v1 }
 0xd85   :  { %1298 = vmatpush3.msra.mxu1 %v1447_v4 }
 0xe3e   :  { %v788_v0 = vpop.f32.mrf.mxu1 }
 0xe3f   :  { %v792_v38 = vadd.f32 %v1165_v37, %v788_v0  ;;  %v412_v37 = vrot.slane %v404_v36, %v1598_v26  ;;  %v283_v0 = vrot.slane %v272_v34, %v1608_v33 }
 0xe40   :  { %v1279_v40 = vpop.f32.mrf.mxu1 }
 0xe41   :  { %1350 = vtanh.f32 %v792_v38  ;;  %v1167_v2 = vmul.f32 -1.442695, %v792_v38  ;;  %v552_v38 = vrot.slane %v544_v39, %v1598_v26  ;;  %v684_v40 = vrot.slane %v1561_v35, %v1598_v26 }
 0xe42   :  { %v423_v57 = vrot.slane %v412_v37, %v1608_v33 }
 0xe43   :  { %1352 = vpow2.f32 %v1167_v2  ;;  %v563_v16 = vrot.slane %v552_v38, %v1608_v33 }
 0xe4e   :  { %v1351_v41 = vpop.eup %1350 }
 0xe4f   :  { %802 = vrot.lane.b32.xlu0 %v1351_v41, %s1398_s18  ;;  %v692_v41 = vrot.slane %v684_v40, %v1598_v26 }
 0xe50   :  { %v1353_v42 = vpop.eup %1352 }
 0xe51   :  { %v796_v43 = vadd.f32 1.0, %v1353_v42 }
 0xe53   :  { %1354 = vrcp.f32 %v796_v43 }
 0xe60   :  { %v1355_v3 = vpop.eup %1354 }
 0xe61   :  { %v800_v4 = vmul.f32 %v1355_v3, %v670_v32 }
 0xec1   :  { %v803_v1 = vpop.permute.xlu0 %802 }
 0xec2   :  { %v805_v44 = vmul.f32 %v1355_v3, %v803_v1 }
 0xec4   :  { %807 = vrot.lane.b32.xlu1 %v805_v44, %s1399_s19 }
 0xf36   :  { %v808_v45 = vpop.permute.xlu1 %807 }
 0xf37   :  { %v810_v46 = vadd.f32 %v808_v45, %v800_v4 }
 0xf39   :  { %1356 = vtanh.f32 %v810_v46 }
 0xf46   :  { %v1357_v47 = vpop.eup %1356 }
 0xf47   :  { %813 = vrot.lane.b32.xlu0 %v1357_v47, %s1398_s18 }
 0xfb9   :  { %v814_v48 = vpop.permute.xlu0 %813 }
 0xfba   :  { %v1581_v49 = vmul.f32 %v1355_v3, %v814_v48  ;;  %v703_v3 = vrot.slane %v692_v41, %v1608_v33 }
 0xfbc   :  { %858 = vrot.lane.b32.xlu1 %v1581_v49, %s1399_s19  ;;  %v824_v2 = vrot.slane %v1581_v49, %v1598_v26  ;;  %v124_v49 = vcombine.high %v123_v27, %v123_v27 }
 0xfbe   :  { %v832_v42 = vrot.slane %v824_v2, %v1598_v26 }
 0xfc0   :  { %v843_v1 = vrot.slane %v832_v42, %v1608_v33 }
0x102e   :  { %v859_v50 = vpop.permute.xlu1 %858 }
0x102f   :  { %1289 = vmatmul.mubr.msk.f32.vlgmr.msra.gmra.mxu0 %vm17_vm1, %v859_v50 }
0x10ef   :  { %v928_v52 = vpop.f32.mrf.mxu0 }
0x10f0   :  { %v932_v53 = vadd.f32 %v1168_v51, %v928_v52  ;;  %v265_v51 = vcombine.high %v264_v31, %v264_v31  ;;  %v138_v52 = vrot.slane %v124_v49, %v1598_v26 }
0x10f1   :  { %v1290_v54 = vpop.f32.mrf.mxu0 }
0x10f2   :  { %1358 = vtanh.f32 %v932_v53  ;;  %v1170_v56 = vmul.f32 -1.442695, %v932_v53 }
0x10f4   :  { %1360 = vpow2.f32 %v1170_v56  ;;  %v146_v56 = vrot.slane %v138_v52, %v1608_v33 }
0x10ff   :  { %v1359_v55 = vpop.eup %1358 }
0x1100   :  { %942 = vrot.lane.b32.xlu0 %v1359_v55, %s1398_s18  ;;  %v405_v55 = vcombine.high %v404_v36, %v404_v36 }
0x1101   :  { %v1361_v58 = vpop.eup %1360 }
0x1102   :  { %v936_v59 = vadd.f32 1.0, %v1361_v58  ;;  %v279_v58 = vrot.slane %v265_v51, %v1598_v26 }
0x1104   :  { %1362 = vrcp.f32 %v936_v59 }
0x1111   :  { %v1363_v60 = vpop.eup %1362 }
0x1112   :  { %v940_v63 = vmul.f32 %v1363_v60, %v810_v46 }
0x1172   :  { %v943_v61 = vpop.permute.xlu0 %942 }
0x1173   :  { %v945_v62 = vmul.f32 %v1363_v60, %v943_v61  ;;  %v287_v61 = vrot.slane %v279_v58, %v1608_v33 }
0x1175   :  { %947 = vrot.lane.b32.xlu1 %v945_v62, %s1399_s19  ;;  %v419_v62 = vrot.slane %v405_v55, %v1598_v26 }
0x11e7   :  { %v948_v5 = vpop.permute.xlu1 %947 }
0x11e8   :  { %v950_v6 = vadd.f32 %v948_v5, %v940_v63  ;;  %v685_v5 = vcombine.high %v684_v40, %v684_v40 }
0x11ea   :  { %1364 = vtanh.f32 %v950_v6 }
0x11f7   :  { %v1365_v7 = vpop.eup %1364 }
0x11f8   :  { %953 = vrot.lane.b32.xlu0 %v1365_v7, %s1398_s18 }
0x126a   :  { %v954_v8 = vpop.permute.xlu0 %953 }
0x126b   :  { %v956_v9 = vmul.f32 %v1363_v60, %v954_v8  ;;  %v545_v60 = vcombine.high %v544_v39, %v544_v39 }
0x126d   :  { %998 = vrot.lane.b32.xlu1 %v956_v9, %s1399_s19  ;;  %v964_v43 = vrot.slane %v956_v9, %v1598_v26  ;;  %v559_v7 = vrot.slane %v545_v60, %v1598_v26  ;;  %v825_v9 = vcombine.high %v824_v2, %v824_v2 }
0x126f   :  { %v972_v35 = vrot.slane %v964_v43, %v1598_v26 }
0x1271   :  { %v983_v44 = vrot.slane %v972_v35, %v1608_v33 }
0x12df   :  { %v999_v10 = vpop.permute.xlu1 %998 }
0x12e0   :  { %1300 = vmatmul.mubr.msk.f32.vlgmr.msra.gmra.mxu1 %vm17_vm1, %v999_v10  ;;  %v567_v10 = vrot.slane %v559_v7, %v1608_v33 }
0x13a0   :  { %v1068_v12 = vpop.f32.mrf.mxu1 }
0x13a1   :  { %v1072_v13 = vadd.f32 %v1171_v11, %v1068_v12  ;;  %v699_v11 = vrot.slane %v685_v5, %v1598_v26  ;;  %v965_v12 = vcombine.high %v964_v43, %v964_v43 }
0x13a2   :  { %v1301_v14 = vpop.f32.mrf.mxu1 }
0x13a3   :  { %1366 = vtanh.f32 %v1072_v13  ;;  %v1173_v17 = vmul.f32 -1.442695, %v1072_v13  ;;  %v707_v13 = vrot.slane %v699_v11, %v1608_v33  ;;  %v839_v14 = vrot.slane %v825_v9, %v1598_v26 }
0x13a5   :  { %1368 = vpow2.f32 %v1173_v17  ;;  %v979_v17 = vrot.slane %v965_v12, %v1598_v26 }
0x13b0   :  { %v1367_v15 = vpop.eup %1366 }
0x13b1   :  { %1082 = vrot.lane.b32.xlu0 %v1367_v15, %s1398_s18  ;;  %v847_v15 = vrot.slane %v839_v14, %v1608_v33 }
0x13b2   :  { %v1369_v18 = vpop.eup %1368 }
0x13b3   :  { %v1076_v19 = vadd.f32 1.0, %v1369_v18  ;;  %v987_v18 = vrot.slane %v979_v17, %v1608_v33 }
0x13b5   :  { %1370 = vrcp.f32 %v1076_v19 }
0x13c2   :  { %v1602_v28 = vpop.eup %1370 }
0x13c3   :  { %v1080_v4 = vmul.f32 %v1602_v28, %v950_v6  ;;  %v427_v6 = vrot.slane %v419_v62, %v1608_v33 }
0x1423   :  { %v1083_v29 = vpop.permute.xlu0 %1082 }
0x1424   :  { %v1085_v32 = vmul.f32 %v1602_v28, %v1083_v29 }
0x1426   :  { %1087 = vrot.lane.b32.xlu1 %v1085_v32, %s1399_s19 }
0x142a   :  { %147 = vrot.lane.b32.xlu1 %v142_v21, %s1399_s19 }
0x142e   :  { %288 = vrot.lane.b32.xlu1 %v283_v0, %s1399_s19 }
0x1432   :  { %428 = vrot.lane.b32.xlu1 %v423_v57, %s1399_s19 }
0x1436   :  { %568 = vrot.lane.b32.xlu1 %v563_v16, %s1399_s19 }
0x143a   :  { %708 = vrot.lane.b32.xlu1 %v703_v3, %s1399_s19 }
0x143e   :  { %848 = vrot.lane.b32.xlu1 %v843_v1, %s1399_s19 }
0x1442   :  { %988 = vrot.lane.b32.xlu1 %v983_v44, %s1399_s19 }
0x1498   :  { %v1088_v45 = vpop.permute.xlu1 %1087 }
0x1499   :  { %v1090_v46 = vadd.f32 %v1088_v45, %v1080_v4 }
0x149b   :  { %1372 = vtanh.f32 %v1090_v46 }
0x149c   :  { %v148_v47 = vpop.permute.xlu1 %147 }
0x149d   :  { %154 = vst.msk [vmem:[#allocation2] sm:$0x1] %vm153_vm2, %v148_v47 }
0x14a0   :  { %v289_v48 = vpop.permute.xlu1 %288 }
0x14a1   :  { %294 = vst.msk [vmem:[#allocation2 + $0x1] sm:$0x1] %vm153_vm2, %v289_v48 }
0x14a4   :  { %v429_v50 = vpop.permute.xlu1 %428 }
0x14a5   :  { %434 = vst.msk [vmem:[#allocation2 + $0x2] sm:$0x1] %vm153_vm2, %v429_v50 }
0x14a8   :  { %v1373_v53 = vpop.eup %1372  ;;  %v569_v54 = vpop.permute.xlu1 %568 }
0x14a9   :  { %574 = vst.msk [vmem:[#allocation2 + $0x3] sm:$0x1] %vm153_vm2, %v569_v54  ;;  %1093 = vrot.lane.b32.xlu0 %v1373_v53, %s1398_s18 }
0x14ac   :  { %v709_v59 = vpop.permute.xlu1 %708 }
0x14ad   :  { %714 = vst.msk [vmem:[#allocation2 + $0x4] sm:$0x1] %vm153_vm2, %v709_v59  ;;  %149 = vrot.lane.b32.xlu0 %v146_v56, %s1399_s19 }
0x14b0   :  { %v849_v63 = vpop.permute.xlu1 %848 }
0x14b1   :  { %854 = vst.msk [vmem:[#allocation2 + $0x5] sm:$0x1] %vm153_vm2, %v849_v63  ;;  %290 = vrot.lane.b32.xlu0 %v287_v61, %s1399_s19 }
0x14b4   :  { %v989_v8 = vpop.permute.xlu1 %988 }
0x14b5   :  { %994 = vst.msk [vmem:[#allocation2 + $0x6] sm:$0x1] %vm153_vm2, %v989_v8  ;;  %430 = vrot.lane.b32.xlu0 %v427_v6, %s1399_s19 }
0x14b9   :  { %570 = vrot.lane.b32.xlu0 %v567_v10, %s1399_s19 }
0x14bd   :  { %710 = vrot.lane.b32.xlu0 %v707_v13, %s1399_s19 }
0x14c1   :  { %850 = vrot.lane.b32.xlu0 %v847_v15, %s1399_s19 }
0x14c5   :  { %990 = vrot.lane.b32.xlu0 %v987_v18, %s1399_s19 }
0x151b   :  { %v1094_v19 = vpop.permute.xlu0 %1093 }
0x151c   :  { %v1096_v20 = vmul.f32 %v1602_v28, %v1094_v19 }
0x151e   :  { %v1104_v22 = vrot.slane %v1096_v20, %v1598_v26 }
0x151f   :  { %v150_v23 = vpop.permute.xlu0 %149 }
0x1520   :  { %v1105_v24 = vcombine.high %v1104_v22, %v1104_v22  ;;  %v1112_v25 = vrot.slane %v1104_v22, %v1598_v26  ;;  %155 = vst.msk [vmem:[#allocation2 + $0x8] sm:$0x1] %vm153_vm2, %v150_v23 }
0x1522   :  { %v1123_v27 = vrot.slane %v1112_v25, %v1608_v33  ;;  %v1119_v29 = vrot.slane %v1105_v24, %v1598_v26 }
0x1523   :  { %v291_v30 = vpop.permute.xlu0 %290 }
0x1524   :  { %295 = vst.msk [vmem:[#allocation2 + $0x9] sm:$0x1] %vm153_vm2, %v291_v30  ;;  %1128 = vrot.lane.b32.xlu1 %v1123_v27, %s1399_s19  ;;  %v1127_v31 = vrot.slane %v1119_v29, %v1608_v33 }
0x1526   :  { %1130 = vrot.lane.b32.xlu0 %v1127_v31, %s1399_s19 }
0x1527   :  { %v431_v28 = vpop.permute.xlu0 %430 }
0x1528   :  { %435 = vst.msk [vmem:[#allocation2 + $0xa] sm:$0x1] %vm153_vm2, %v431_v28 }
0x152b   :  { %v571_v32 = vpop.permute.xlu0 %570 }
0x152c   :  { %575 = vst.msk [vmem:[#allocation2 + $0xb] sm:$0x1] %vm153_vm2, %v571_v32 }
0x152f   :  { %v711_v34 = vpop.permute.xlu0 %710 }
0x1530   :  { %715 = vst.msk [vmem:[#allocation2 + $0xc] sm:$0x1] %vm153_vm2, %v711_v34 }
0x1533   :  { %v851_v36 = vpop.permute.xlu0 %850 }
0x1534   :  { %855 = vst.msk [vmem:[#allocation2 + $0xd] sm:$0x1] %vm153_vm2, %v851_v36 }
0x1537   :  { %v991_v26 = vpop.permute.xlu0 %990 }
0x1538   :  { %995 = vst.msk [vmem:[#allocation2 + $0xe] sm:$0x1] %vm153_vm2, %v991_v26 }
0x1596   :  { %v1129_v33 = vpop.permute.xlu1 %1128 }
0x1597   :  { %1134 = vst.msk [vmem:[#allocation2 + $0x7] sm:$0x1] %vm153_vm2, %v1129_v33 }
0x1598   :  { %v1131_v21 = vpop.permute.xlu0 %1130 }
0x1599   :  { %1135 = vst.msk [vmem:[#allocation2 + $0xf] sm:$0x1] %vm153_vm2, %v1131_v21 }
0x159a   :  { %1385 = shalt.err (!%p1382_p4)
}
0x159b   :  { %s1402_s8 = smov 128   ;;  %s1403_s9 = smov 8  }
0x159c   :  { %1147 = dma.vmem_to_hbm [thread:$0]  %s1142_s6, 256, %s1692_s2, [#allocation3], %s1402_s8, %s1402_s8, %s1403_s9  }
0x159d   :  { %1394 = dma.done.wait [#allocation3], 256  }
0x159e   :  { %1395 = vsyncadd [#allocation3], 4294967040 }
0x159f   :  { %1151 = vsyncpa [#allocation3], 1 }

</bundles_post_ra>
